<compile_context>
chip_gen: v7x
topology: tpu7x:2x2x1
jax: 0.10.0
libtpu: 0.0.40
codegen_flags: <defaults>
</compile_context>

<pallas_src>
import jax
import jax.numpy as jnp
from jax.experimental import pallas as pl
from jax.experimental.pallas import tpu as pltpu


def linear_ones_relu6_kernel(x_ref, o_ref):
    # x_ref: (1, 3) f32 in SMEM -> three scalar reads on the scalar ALU.
    # F.linear(x, ones(N, K)) == sum_k x[0, k], identical for every output n.
    s = x_ref[0, 0] + x_ref[0, 1] + x_ref[0, 2]
    # ReLU6: clamp to [0, 6] (scalar min/max on the scalar path).
    v = jnp.minimum(jnp.maximum(s, jnp.float32(0.0)), jnp.float32(6.0))
    # Single scalar -> lane broadcast store into the (1, N) output tile.
    o_ref[...] = jnp.full(o_ref.shape, v, dtype=o_ref.dtype)


def linear_ones_relu6(x, n_out=4):
    """Computes clip(x @ ones(n_out, K).T, 0, 6) for x of shape (1, 3)."""
    B, K = x.shape
    assert (B, K) == (1, 3), "kernel is specialized to the module's (1, 3) input"
    return pl.pallas_call(
        linear_ones_relu6_kernel,
        out_shape=jax.ShapeDtypeStruct((B, n_out), x.dtype),
        in_specs=[
            # 3 floats -> SMEM; scalar reads, no padded VMEM tile DMA for x.
            pl.BlockSpec(memory_space=pltpu.MemorySpace.SMEM),
        ],
        out_specs=pl.BlockSpec(memory_space=pltpu.MemorySpace.VMEM),
        cost_estimate=pl.CostEstimate(
            flops=2 * B * K * n_out,
            bytes_accessed=(B * K + B * n_out) * 4,
            transcendentals=0,
        ),
    )(x)


if __name__ == "__main__":
    key = jax.random.PRNGKey(0)
    # Matches the module's input: x1 = torch.randn(1, 3)
    x1 = jax.random.normal(key, (1, 3), dtype=jnp.float32)

    out = linear_ones_relu6(x1)
    out = jax.block_until_ready(out)

    # Sanity check against plain-JAX reference of the original module:
    # clip(x1 @ ones(4, 3).T, 0, 6)
    w = jnp.ones((4, 3), dtype=jnp.float32)
    ref = jnp.clip(x1 @ w.T, 0.0, 6.0)
    assert out.shape == (1, 4)
    assert jnp.allclose(out, ref, atol=1e-5), (out, ref)

    print("KERNEL_OK")
</pallas_src>

<mosaic_0001>
module attributes {stable_mosaic.version = 11 : i64} {
  func.func @linear_ones_relu6_kernel(%arg0: memref<1x3xf32, #tpu.memory_space<smem>>, %arg1: memref<1x4xf32, #tpu.memory_space<vmem>>) attributes {dimension_semantics = [], scalar_prefetch = 0 : i64, scratch_operands = 0 : i64, tpu.core_type = #tpu.core_type<tc>} {
    %c0 = arith.constant 0 : index
    %c0_0 = arith.constant 0 : index
    %0 = memref.load %arg0[%c0, %c0_0] : memref<1x3xf32, #tpu.memory_space<smem>>
    %c0_1 = arith.constant 0 : index
    %c1 = arith.constant 1 : index
    %1 = memref.load %arg0[%c0_1, %c1] : memref<1x3xf32, #tpu.memory_space<smem>>
    %2 = arith.addf %0, %1 : f32
    %c0_2 = arith.constant 0 : index
    %c2 = arith.constant 2 : index
    %3 = memref.load %arg0[%c0_2, %c2] : memref<1x3xf32, #tpu.memory_space<smem>>
    %4 = arith.addf %2, %3 : f32
    %cst = arith.constant 0.000000e+00 : f32
    %5 = arith.maximumf %4, %cst : f32
    %cst_3 = arith.constant 6.000000e+00 : f32
    %6 = arith.minimumf %5, %cst_3 : f32
    %7 = vector.broadcast %6 : f32 to vector<1x4xf32>
    %c0_4 = arith.constant 0 : index
    %c0_5 = arith.constant 0 : index
    %8 = vector.load %arg1[%c0_4, %c0_5] : memref<1x4xf32, #tpu.memory_space<vmem>>, vector<1x4xf32>
    tpu.vector_store %arg1[%c0_4, %c0_5], %7 {strides = array<i32>} : memref<1x4xf32, #tpu.memory_space<vmem>>, vector<1x4xf32>,
    return
  }
}

</mosaic_0001>

<bundles_post_ra>
// kernel: tpu_custom_call.1
= control target key start
LH: loop header
LB: loop body
LE: loop exit
PB: predicated region body
PF: predicated region fallthrough
CT: control target
= control target key end

     0   :  { %6 = vsyncpa [#allocation4], 0  ;;  %s125_s0 = inlined_call_operand.hbm [shape: f32[1,3], index: 0, kind: input, shape index: {}]   ;;  %s126_s1 = inlined_call_operand.hbm [shape: f32[1,4], index: 1, kind: output, shape index: {}]  }
   0x1   :  { %7 = vsyncpa [#allocation3], 0  ;;  %s51_s8 = scalar_lea.hbm %s125_s0, 16 }
   0x2   :  { %p52_p0 = scmp.ne.s32.totalorder %s125_s0, %s51_s8  ;;  %p55_p1 = scmp.lt.u32.totalorder %s51_s8, %s125_s0 }
   0x4   :  { %p57_p2 = pnand %p55_p1, %p52_p0 }
   0x6   :  { %60 = shalt.err (!%p57_p2)
}
   0x7   :  { %s87_s13 = smov [#allocation2]  }
   0x8   :  { %15 = dma.hbm_to_smem %s125_s0, 16, %s87_s13, [#allocation4]  }
   0x9   :  { %83 = dma.done.wait [#allocation4], 16  }
   0xa   :  { %84 = vsyncadd [#allocation4], 4294967280 }
   0xb   :  { %19 = sfence }
   0xc   :  { %s20_s16 = sld [smem:[#allocation2]]  ;;  %s45_s17 = sld [smem:[#allocation2 + $0x1]]  ;;  %vm28_vm0 = vcmask 24576  }
   0xd   :  { %s46_s18 = sld [smem:[#allocation2 + $0x2]]  ;;  %s88_s21 = smov [#allocation5]  }
   0xe   :  { %s36_s22 = sshll.u32 %s88_s21, 4  ;;  %s89_s23 = smov 0.0   ;;  %s37_s22 = int_to_ptr.vmem [resolvable:$true] %s36_s22 }
   0xf   :  { %s90_s25 = smov 6.0   ;;  %s61_s27 = scalar_lea.vmem %s37_s22, 16 }
  0x10   :  { %p62_p3 = scmp.ne.s32.totalorder %s37_s22, %s61_s27  ;;  %s65_s0 = scalar_lea.vmem %s37_s22, 32 }
  0x11   :  { %p66_p4 = scmp.lt.s32.totalorder %s37_s22, %s37_s22  ;;  %p67_p5 = scmp.lt.s32.totalorder %s65_s0, %s61_s27 }
  0x12   :  { %s22_s19 = sadd.f32 %s45_s17, %s20_s16 }
  0x13   :  { %p68_p6 = por %p67_p5, %p66_p4 }
  0x14   :  { %s24_s20 = sadd.f32 %s46_s18, %s22_s19 }
  0x15   :  { %p69_p7 = pnand %p68_p6, %p62_p3 }
  0x16   :  { %s25_s24 = smax.f32 %s89_s23, %s24_s20 }
  0x17   :  { %s26_s26 = smin.f32 %s90_s25, %s25_s24 }
  0x18   :  { %v27_v0 = vstv %s26_s26 }
  0x19   :  { %29 = vst.msk [vmem:[#allocation5] sm:$0x1] %vm28_vm0, %v27_v0 }
  0x1a   :  { %72 = shalt.err (!%p69_p7)
}
  0x1b   :  { %s73_s30 = scalar_lea.hbm %s126_s1, 16 }
  0x1c   :  { %p74_p8 = scmp.ne.s32.totalorder %s126_s1, %s73_s30  ;;  %p77_p9 = scmp.lt.u32.totalorder %s73_s30, %s126_s1 }
  0x1e   :  { %p79_p10 = pnand %p77_p9, %p74_p8 }
  0x20   :  { %82 = shalt.err (!%p79_p10)
}
  0x21   :  { %39 = dma.vmem_to_hbm [thread:$0]  %s37_s22, 16, %s126_s1, [#allocation3]  }
  0x22   :  { %85 = dma.done.wait [#allocation3], 16  }
  0x23   :  { %86 = vsyncadd [#allocation3], 4294967280 }
  0x24   :  { %43 = vsyncpa [#allocation3], 1 }
  0x25   :  { %44 = vsyncpa [#allocation4], 1 }

</bundles_post_ra>
